<compile_context>
chip_gen: v6e
topology: v6e:2x2x1
jax: 0.10.0
libtpu: 0.0.40
codegen_flags: <defaults>
</compile_context>

<pallas_src>
import jax
import jax.numpy as jnp
from jax.experimental import pallas as pl
from jax.experimental.pallas import tpu as pltpu


# ----------------------------- kernel ------------------------------------- #

def _mlp_kernel(x_ref, w1_ref, b1_ref, w2_ref, b2_ref, o_ref):
    # dropout (eval mode == identity) -> fc1 -> relu -> fc2 -> tanh * 10
    x = x_ref[...]

    # fc1 + ReLU (MXU, f32 accumulation)
    h = jnp.dot(x, w1_ref[...], preferred_element_type=jnp.float32)
    h = jnp.maximum(h + b1_ref[...], 0.0)          # b1 is [1, Hp], broadcasts
    h = h.astype(w2_ref.dtype)                     # keep 2nd matmul in native dtype

    # fc2 + Tanh * 10 (tanh goes to the EUP slot; cheap epilogue)
    y = jnp.dot(h, w2_ref[...], preferred_element_type=jnp.float32)
    y = y + b2_ref[...]                            # b2 is [1, O]
    o_ref[...] = (jnp.tanh(y) * 10.0).astype(o_ref.dtype)


# ----------------------------- helpers ------------------------------------ #

def _round_up(n, m):
    return ((n + m - 1) // m) * m


def _sublane(dtype):
    # dtype-aware sublane multiple: 8 for 4-byte, 16 for 2-byte, 32 for 1-byte
    return {4: 8, 2: 16, 1: 32}.get(jnp.dtype(dtype).itemsize, 8)


def _vmem_capacity_bytes():
    try:
        return int(pltpu.get_tpu_info().vmem_capacity_bytes)
    except Exception:
        return 64 * 1024 * 1024  # conservative default (v7x per-TC)


def prepare_mlp_params(w1, b1, w2, b2):
    """One-time parameter prep (hoisted out of the forward path).

    w1: [K, H] (already transposed vs torch's [H, K]), b1: [H],
    w2: [H, O], b2: [O].
    Hidden dim is zero-padded to a multiple of 128 (exact: relu(0+0)=0 feeds
    zero rows of W2).  Output dim stays unpadded so the kernel writes the real
    [B, O] output and no post-kernel slice is needed.
    """
    K, H = w1.shape
    Hw, O = w2.shape
    assert Hw == H and b1.shape == (H,) and b2.shape == (O,)
    Hp = _round_up(H, 128)

    def pad(a, axis, new_size):
        if a.shape[axis] == new_size:
            return a
        widths = [(0, 0)] * a.ndim
        widths[axis] = (0, new_size - a.shape[axis])
        return jnp.pad(a, widths)

    w1p = pad(w1, 1, Hp)                 # [K, Hp]
    b1p = pad(b1.reshape(1, H), 1, Hp)   # [1, Hp]
    w2p = pad(w2, 0, Hp)                 # [Hp, O]
    b2p = b2.reshape(1, O)               # [1, O]
    return w1p, b1p, w2p, b2p


# ----------------------------- forward ------------------------------------ #

def mlp_forward(x, params, *, block_b=None):
    """x: [B, K]; params = prepare_mlp_params(...).  Returns [B, O] in x.dtype."""
    w1p, b1p, w2p, b2p = params
    B, K = x.shape
    Kw, Hp = w1p.shape
    Hw, O = w2p.shape
    assert Kw == K and Hw == Hp and b1p.shape == (1, Hp) and b2p.shape == (1, O)

    cap = _vmem_capacity_bytes()
    sub = _sublane(x.dtype)

    # Batch tile: large tiles on v5e/v6e (128 MiB VMEM), 256 on v7x (64 MiB);
    # ensure >= 2 tiles when the batch allows so v7x's 2 TCs both get work.
    if block_b is None:
        block_b = 512 if cap >= 96 * 1024 * 1024 else 256
    TM = min(block_b, _round_up(B, sub))
    if B >= 256 and pl.cdiv(B, TM) < 2:
        TM = _round_up(pl.cdiv(B, 2), 128)
    grid = (pl.cdiv(B, TM),)

    isz = jnp.dtype(x.dtype).itemsize
    wsz = jnp.dtype(w1p.dtype).itemsize
    weight_bytes = (w1p.size + b1p.size) * wsz + (w2p.size + b2p.size) * jnp.dtype(w2p.dtype).itemsize
    act_bytes = 2 * TM * K * isz + 2 * TM * O * isz          # double-buffered x / out tiles
    scratch_bytes = 2 * TM * Hp * 4                          # f32 hidden tile + slop
    needed = weight_bytes + act_bytes + scratch_bytes + (8 << 20)
    vmem_limit = int(min(max(needed, 32 << 20), cap - (8 << 20)))

    # TODO(synk): if the resident weights exceed ~60% of VMEM, add a K/Hp grid
    # axis ('arbitrary') with a VMEM f32 accumulator instead of asserting.
    assert weight_bytes < 0.6 * cap, "weights too large to hold resident in VMEM"

    cost = pl.CostEstimate(
        flops=2 * B * (K * Hp + Hp * O),
        transcendentals=B * O,                       # tanh
        bytes_accessed=B * K * isz + weight_bytes + B * O * isz,
    )

    # Weights/biases: constant block index -> resident; single VMEM buffer.
    resident = dict(pipeline_mode=pl.Buffered(1))

    return pl.pallas_call(
        _mlp_kernel,
        out_shape=jax.ShapeDtypeStruct((B, O), x.dtype),
        grid_spec=pltpu.PrefetchScalarGridSpec(
            num_scalar_prefetch=0,
            grid=grid,
            in_specs=[
                # x: batch-tiled, double-buffered by the BlockSpec pipeline.
                pl.BlockSpec((TM, K), lambda i: (i, 0)),
                pl.BlockSpec((K, Hp), lambda i: (0, 0), **resident),
                pl.BlockSpec((1, Hp), lambda i: (0, 0), **resident),
                pl.BlockSpec((Hp, O), lambda i: (0, 0), **resident),
                pl.BlockSpec((1, O), lambda i: (0, 0), **resident),
            ],
            out_specs=pl.BlockSpec((TM, O), lambda i: (i, 0)),
        ),
        compiler_params=pltpu.CompilerParams(
            # Batch tiles are independent -> shard across v7x's 2 TensorCores.
            dimension_semantics=("parallel",),
            vmem_limit_bytes=vmem_limit,
        ),
        cost_estimate=cost,
    )(x, w1p, b1p, w2p, b2p)


# ----------------------------- init / reference ---------------------------- #

def init_linear_params(key, in_features, out_features, dtype=jnp.float32):
    """Mirrors torch.nn.Linear.reset_parameters(): U(-1/sqrt(in), 1/sqrt(in)).
    Weight is returned already transposed to [in_features, out_features]."""
    kw, kb = jax.random.split(key)
    bound = 1.0 / (in_features ** 0.5)
    w = jax.random.uniform(kw, (in_features, out_features), dtype,
                           minval=-bound, maxval=bound)
    b = jax.random.uniform(kb, (out_features,), dtype,
                           minval=-bound, maxval=bound)
    return w, b


def _reference(x, w1, b1, w2, b2):
    # Pure-JAX reference (eval-mode dropout == identity).
    return jnp.tanh(jnp.maximum(x @ w1 + b1, 0.0) @ w2 + b2) * 10.0


# ----------------------------- demo / test --------------------------------- #

if __name__ == "__main__":
    key = jax.random.PRNGKey(0)

    # --- Small, module-scale shapes ---
    batch, input_size, hidden_size, output_size = 2, 16, 32, 8
    kx, k1, k2, k3 = jax.random.split(key, 4)
    x = jax.random.normal(kx, (batch, input_size), jnp.float32)
    w1, b1 = init_linear_params(k1, input_size, hidden_size)
    w2, b2 = init_linear_params(k2, hidden_size, output_size)
    params = prepare_mlp_params(w1, b1, w2, b2)        # one-time prep

    out = jax.block_until_ready(mlp_forward(x, params))
    ref = _reference(x, w1, b1, w2, b2)
    assert out.shape == (batch, output_size)
    assert jnp.allclose(out, ref, atol=1e-5, rtol=1e-5)

    # --- Larger shape: multi-tile grid with a ragged last batch tile,
    #     unaligned H (padded in params) and small unaligned O (unpadded) ---
    B2, K2, H2, O2 = 300, 64, 96, 24
    x2 = jax.random.normal(k3, (B2, K2), jnp.float32)
    kw1, kw2 = jax.random.split(k3)
    w1b, b1b = init_linear_params(kw1, K2, H2)
    w2b, b2b = init_linear_params(kw2, H2, O2)
    params2 = prepare_mlp_params(w1b, b1b, w2b, b2b)

    out2 = jax.block_until_ready(mlp_forward(x2, params2, block_b=128))
    ref2 = _reference(x2, w1b, b1b, w2b, b2b)
    assert out2.shape == (B2, O2)
    assert jnp.allclose(out2, ref2, atol=1e-4, rtol=1e-4)

    print("KERNEL_OK")
</pallas_src>

<mosaic_0001>
module attributes {stable_mosaic.version = 11 : i64} {
  func.func @_mlp_kernel(%arg0: i32, %arg1: memref<8x16xf32, #tpu.memory_space<vmem>>, %arg2: memref<16x128xf32, #tpu.memory_space<vmem>>, %arg3: memref<1x128xf32, #tpu.memory_space<vmem>>, %arg4: memref<128x8xf32, #tpu.memory_space<vmem>>, %arg5: memref<1x8xf32, #tpu.memory_space<vmem>>, %arg6: memref<8x8xf32, #tpu.memory_space<vmem>>) attributes {dimension_semantics = [#tpu.dimension_semantics<parallel>], iteration_bounds = array<i64: 1>, scalar_prefetch = 0 : i64, scratch_operands = 0 : i64, tpu.core_type = #tpu.core_type<tc>, window_params = [{transform_indices = @transform_0, window_bounds = array<i64: 8, 16>}, {pipeline_mode = #tpu.pipeline_mode<synchronous>, transform_indices = @transform_1, window_bounds = array<i64: 16, 128>}, {pipeline_mode = #tpu.pipeline_mode<synchronous>, transform_indices = @transform_2, window_bounds = array<i64: 1, 128>}, {pipeline_mode = #tpu.pipeline_mode<synchronous>, transform_indices = @transform_3, window_bounds = array<i64: 128, 8>}, {pipeline_mode = #tpu.pipeline_mode<synchronous>, transform_indices = @transform_4, window_bounds = array<i64: 1, 8>}, {transform_indices = @transform_5, window_bounds = array<i64: 8, 8>}]} {
    %c0 = arith.constant 0 : index
    %c0_0 = arith.constant 0 : index
    %0 = vector.load %arg1[%c0, %c0_0] : memref<8x16xf32, #tpu.memory_space<vmem>>, vector<8x16xf32>
    %c0_1 = arith.constant 0 : index
    %c0_2 = arith.constant 0 : index
    %1 = vector.load %arg2[%c0_1, %c0_2] : memref<16x128xf32, #tpu.memory_space<vmem>>, vector<16x128xf32>
    %cst = arith.constant dense<0.000000e+00> : vector<8x128xf32>
    %2 = tpu.matmul %0, %1, %cst {dimension_numbers = #tpu.dot_dimension_numbers<[1], [0], [0], [1], [0, 0, 1, 1], [], []>} : vector<8x16xf32>, vector<16x128xf32>, vector<8x128xf32> -> vector<8x128xf32>
    %c0_3 = arith.constant 0 : index
    %c0_4 = arith.constant 0 : index
    %3 = vector.load %arg3[%c0_3, %c0_4] : memref<1x128xf32, #tpu.memory_space<vmem>>, vector<1x128xf32>
    %4 = vector.broadcast %3 : vector<1x128xf32> to vector<8x128xf32>
    %5 = arith.addf %2, %4 : vector<8x128xf32>
    %cst_5 = arith.constant 0.000000e+00 : f32
    %6 = vector.broadcast %cst_5 : f32 to vector<8x128xf32>
    %7 = arith.maximumf %5, %6 : vector<8x128xf32>
    %c0_6 = arith.constant 0 : index
    %c0_7 = arith.constant 0 : index
    %8 = vector.load %arg4[%c0_6, %c0_7] : memref<128x8xf32, #tpu.memory_space<vmem>>, vector<128x8xf32>
    %cst_8 = arith.constant dense<0.000000e+00> : vector<8x8xf32>
    %9 = tpu.matmul %7, %8, %cst_8 {dimension_numbers = #tpu.dot_dimension_numbers<[1], [0], [0], [1], [0, 0, 1, 1], [], []>} : vector<8x128xf32>, vector<128x8xf32>, vector<8x8xf32> -> vector<8x8xf32>
    %c0_9 = arith.constant 0 : index
    %c0_10 = arith.constant 0 : index
    %10 = vector.load %arg5[%c0_9, %c0_10] : memref<1x8xf32, #tpu.memory_space<vmem>>, vector<1x8xf32>
    %11 = vector.broadcast %10 : vector<1x8xf32> to vector<8x8xf32>
    %12 = arith.addf %9, %11 : vector<8x8xf32>
    %13 = math.tanh %12 : vector<8x8xf32>
    %cst_11 = arith.constant 1.000000e+01 : f32
    %14 = vector.broadcast %cst_11 : f32 to vector<8x8xf32>
    %15 = arith.mulf %13, %14 : vector<8x8xf32>
    %c0_12 = arith.constant 0 : index
    %c0_13 = arith.constant 0 : index
    %16 = vector.load %arg6[%c0_12, %c0_13] : memref<8x8xf32, #tpu.memory_space<vmem>>, vector<8x8xf32>
    tpu.vector_store %arg6[%c0_12, %c0_13], %15 {strides = array<i32>} : memref<8x8xf32, #tpu.memory_space<vmem>>, vector<8x8xf32>,
    return
  }
  func.func @transform_0(%arg0: i32) -> (i32, i32) {
    %c0_i32 = arith.constant 0 : i32
    %c0_i32_0 = arith.constant 0 : i32
    return %arg0, %c0_i32 : i32, i32
  }
  func.func @transform_1(%arg0: i32) -> (i32, i32) {
    %c0_i32 = arith.constant 0 : i32
    %c0_i32_0 = arith.constant 0 : i32
    %c0_i32_1 = arith.constant 0 : i32
    return %c0_i32, %c0_i32_0 : i32, i32
  }
  func.func @transform_2(%arg0: i32) -> (i32, i32) {
    %c0_i32 = arith.constant 0 : i32
    %c0_i32_0 = arith.constant 0 : i32
    %c0_i32_1 = arith.constant 0 : i32
    return %c0_i32, %c0_i32_0 : i32, i32
  }
  func.func @transform_3(%arg0: i32) -> (i32, i32) {
    %c0_i32 = arith.constant 0 : i32
    %c0_i32_0 = arith.constant 0 : i32
    %c0_i32_1 = arith.constant 0 : i32
    return %c0_i32, %c0_i32_0 : i32, i32
  }
  func.func @transform_4(%arg0: i32) -> (i32, i32) {
    %c0_i32 = arith.constant 0 : i32
    %c0_i32_0 = arith.constant 0 : i32
    %c0_i32_1 = arith.constant 0 : i32
    return %c0_i32, %c0_i32_0 : i32, i32
  }
  func.func @transform_5(%arg0: i32) -> (i32, i32) {
    %c0_i32 = arith.constant 0 : i32
    %c0_i32_0 = arith.constant 0 : i32
    return %arg0, %c0_i32 : i32, i32
  }
}

</mosaic_0001>

<bundles_post_ra>
// kernel: tpu_custom_call.1
= control target key start
LH: loop header
LB: loop body
LE: loop exit
PB: predicated region body
PF: predicated region fallthrough
CT: control target
= control target key end

     0   :  { %10 = vsyncpa [#allocation3], 0  ;;  %v313_v1 = vmov 0.0   ;;  %vm314_vm0 = vmmov 0   ;;  %vm31_vm1 = vcmask 130048   ;;  %vm201_vm2 = vcmask 64512   ;;  %s416_s0 = inlined_call_operand.vmem [shape: f32[2,16], index: 0, kind: input, shape index: {}]   ;;  %s417_s1 = inlined_call_operand.vmem [shape: f32[16,128], index: 1, kind: input, shape index: {}]   ;;  %s418_s2 = inlined_call_operand.vmem [shape: f32[1,128], index: 2, kind: input, shape index: {}]   ;;  %s419_s3 = inlined_call_operand.vmem [shape: f32[128,8], index: 3, kind: input, shape index: {}]   ;;  %s420_s4 = inlined_call_operand.vmem [shape: f32[1,8], index: 4, kind: input, shape index: {}]   ;;  %s421_s5 = inlined_call_operand.hbm [shape: f32[2,8], index: 5, kind: output, shape index: {}]  }
   0x1   :  { %v23_v0 = vld [vmem:[%s417_s1 + $0x8] sm:$0xff]  ;;  %242 = vmatprep.subr.mxu0 %v313_v1  ;;  %v22_v2 = vld [vmem:[%s417_s1] sm:$0xff]  ;;  %246 = vmatprep.mubr.msk.f32.mxu0 %vm314_vm0, %v313_v1  ;;  %v121_v3 = vld [vmem:[%s419_s3 + $0x78] sm:$0xff] }
   0x2   :  { %243 = vmatpush3.msra.mxu0 %v23_v0  ;;  %v21_v4 = vld [vmem:[%s416_s0] sm:$0xff]  ;;  %249 = vmatprep.subr.mxu1 %v313_v1  ;;  %v120_v5 = vld [vmem:[%s419_s3 + $0x70] sm:$0xff]  ;;  %v119_v6 = vld [vmem:[%s419_s3 + $0x68] sm:$0xff] }
   0x3   :  { %244 = vmatprep.subr.mxu0 %v313_v1  ;;  %250 = vmatpush3.msra.mxu1 %v121_v3  ;;  %v118_v7 = vld [vmem:[%s419_s3 + $0x60] sm:$0xff]  ;;  %v117_v8 = vld [vmem:[%s419_s3 + $0x58] sm:$0xff]  ;;  %v116_v9 = vld [vmem:[%s419_s3 + $0x50] sm:$0xff] }
   0x4   :  { %245 = vmatpush3.msra.mxu0 %v22_v2  ;;  %251 = vmatprep.subr.mxu1 %v313_v1  ;;  %v115_v10 = vld [vmem:[%s419_s3 + $0x48] sm:$0xff]  ;;  %v114_v11 = vld [vmem:[%s419_s3 + $0x40] sm:$0xff]  ;;  %v113_v12 = vld [vmem:[%s419_s3 + $0x38] sm:$0xff] }
   0x5   :  { %247 = vmatmul.mubr.msk.f32.vlgmr.msra.gmra.mxu0 %vm31_vm1, %v21_v4  ;;  %252 = vmatpush3.msra.mxu1 %v120_v5  ;;  %v112_v13 = vld [vmem:[%s419_s3 + $0x30] sm:$0xff]  ;;  %v111_v14 = vld [vmem:[%s419_s3 + $0x28] sm:$0xff]  ;;  %v110_v15 = vld [vmem:[%s419_s3 + $0x20] sm:$0xff] }
   0x6   :  { %253 = vmatprep.subr.mxu1 %v313_v1  ;;  %281 = vmatprep.mubr.msk.f32.mxu1 %vm314_vm0, %v313_v1  ;;  %v109_v16 = vld [vmem:[%s419_s3 + $0x18] sm:$0xff]  ;;  %v108_v17 = vld [vmem:[%s419_s3 + $0x10] sm:$0xff]  ;;  %v107_v18 = vld [vmem:[%s419_s3 + $0x8] sm:$0xff] }
   0x7   :  { %254 = vmatpush3.msra.mxu1 %v119_v6  ;;  %v106_v19 = vld [vmem:[%s419_s3] sm:$0xff] }
   0x8   :  { %255 = vmatprep.subr.mxu1 %v313_v1  ;;  %v219_v20 = vld [vmem:[%s418_s2] ss:$0 sm:$0xff] }
   0x9   :  { %256 = vmatpush3.msra.mxu1 %v118_v7  ;;  %v221_v25 = vld [vmem:[%s420_s4] ss:$0 sm:$0xff] }
   0xa   :  { %257 = vmatprep.subr.mxu1 %v313_v1 }
   0xb   :  { %258 = vmatpush3.msra.mxu1 %v117_v8 }
   0xc   :  { %259 = vmatprep.subr.mxu1 %v313_v1 }
   0xd   :  { %260 = vmatpush3.msra.mxu1 %v116_v9 }
   0xe   :  { %261 = vmatprep.subr.mxu1 %v313_v1 }
   0xf   :  { %262 = vmatpush3.msra.mxu1 %v115_v10 }
  0x10   :  { %263 = vmatprep.subr.mxu1 %v313_v1 }
  0x11   :  { %264 = vmatpush3.msra.mxu1 %v114_v11 }
  0x12   :  { %265 = vmatprep.subr.mxu1 %v313_v1 }
  0x13   :  { %266 = vmatpush3.msra.mxu1 %v113_v12 }
  0x14   :  { %267 = vmatprep.subr.mxu1 %v313_v1 }
  0x15   :  { %268 = vmatpush3.msra.mxu1 %v112_v13 }
  0x16   :  { %269 = vmatprep.subr.mxu1 %v313_v1 }
  0x17   :  { %270 = vmatpush3.msra.mxu1 %v111_v14 }
  0x18   :  { %271 = vmatprep.subr.mxu1 %v313_v1 }
  0x19   :  { %272 = vmatpush3.msra.mxu1 %v110_v15 }
  0x1a   :  { %273 = vmatprep.subr.mxu1 %v313_v1 }
  0x1b   :  { %274 = vmatpush3.msra.mxu1 %v109_v16 }
  0x1c   :  { %275 = vmatprep.subr.mxu1 %v313_v1 }
  0x1d   :  { %276 = vmatpush3.msra.mxu1 %v108_v17 }
  0x1e   :  { %277 = vmatprep.subr.mxu1 %v313_v1 }
  0x1f   :  { %278 = vmatpush3.msra.mxu1 %v107_v18 }
  0x20   :  { %279 = vmatprep.subr.mxu1 %v313_v1 }
  0x21   :  { %280 = vmatpush3.msra.mxu1 %v106_v19 }
  0xc5   :  { %v101_v21 = vpop.f32.mrf.mxu0 }
  0xc6   :  { %v102_v22 = vadd.f32 %v219_v20, %v101_v21 }
  0xc7   :  { %v248_v23 = vpop.f32.mrf.mxu0 }
  0xc8   :  { %v105_v24 = vmax.f32 %v102_v22, 0.0 }
  0xca   :  { %282 = vmatmul.mubr.f32.vlgmr.msra.gmra.mxu1 %v105_v24 }
 0x18a   :  { %v195_v26 = vpop.f32.mrf.mxu1 }
 0x18b   :  { %v196_v27 = vadd.f32 %v221_v25, %v195_v26 }
 0x18c   :  { %v283_v28 = vpop.f32.mrf.mxu1 }
 0x18d   :  { %289 = vtanh.f32 %v196_v27 }
 0x19a   :  { %v290_v29 = vpop.eup %289 }
 0x19b   :  { %v200_v30 = vmul.f32 10.0, %v290_v29 }
 0x19d   :  { %202 = vst.msk [vmem:[#allocation2] sm:$0xff] %vm201_vm2, %v200_v30 }
 0x19e   :  { %207 = vsyncadd [#allocation3], 96  ;;  %s315_s3 = smov [#allocation2]  }
 0x19f   :  { %s208_s2 = sshll.u32 %s315_s3, 4  ;;  %s209_s2 = int_to_ptr.vmem [resolvable:$true] %s208_s2 }
 0x1a0   :  { %s291_s6 = scalar_lea.vmem %s209_s2, 32  ;;  %s295_s7 = scalar_lea.vmem %s209_s2, 128 }
 0x1a1   :  { %p292_p0 = scmp.ne.s32.totalorder %s209_s2, %s291_s6  ;;  %p296_p1 = scmp.lt.s32.totalorder %s209_s2, %s209_s2 }
 0x1a2   :  { %p297_p2 = scmp.lt.s32.totalorder %s295_s7, %s291_s6 }
 0x1a4   :  { %p298_p3 = por %p297_p2, %p296_p1 }
 0x1a6   :  { %p299_p4 = pnand %p298_p3, %p292_p0 }
 0x1a8   :  { %302 = shalt.err (!%p299_p4)
}
 0x1a9   :  { %s316_s4 = smov 32   ;;  %s317_s8 = smov 2  }
 0x1aa   :  { %214 = dma.vmem_to_hbm [thread:$0]  %s209_s2, 32, %s421_s5, [#allocation3], %s316_s4, %s316_s4, %s317_s8  }
 0x1ab   :  { %311 = dma.done.wait [#allocation3], 128  }
 0x1ac   :  { %312 = vsyncadd [#allocation3], 4294967168 }
 0x1ad   :  { %218 = vsyncpa [#allocation3], 1 }

</bundles_post_ra>
